<compile_context>
chip_gen: v7x
topology: tpu7x:2x2x1
jax: 0.10.0
libtpu: 0.0.40
codegen_flags: <defaults>
</compile_context>

<pallas_src>
import functools

import jax
import jax.numpy as jnp
from jax import lax
from jax.experimental import pallas as pl
from jax.experimental.pallas import tpu as pltpu


# ----------------------------------------------------------------------------
# Phase 1: channel max / channel sum, streamed over (N, C-tiles)
# ----------------------------------------------------------------------------
def _compress_kernel(x_ref, comp_ref):
    """x_ref: VMEM (1, TC, HW) f32 tile of x.
       comp_ref: VMEM (1, 2, HW) f32 accumulator (resident across the C axis):
                 row 0 = running channel max, row 1 = running channel sum."""
    c = pl.program_id(1)
    x = x_ref[...]                                     # (1, TC, HW)
    part_max = jnp.max(x, axis=1, keepdims=True)       # (1, 1, HW)
    part_sum = jnp.sum(x, axis=1, keepdims=True)       # (1, 1, HW)

    @pl.when(c == 0)
    def _():
        comp_ref[:, 0:1, :] = part_max
        comp_ref[:, 1:2, :] = part_sum

    @pl.when(c > 0)
    def _():
        comp_ref[:, 0:1, :] = jnp.maximum(comp_ref[:, 0:1, :], part_max)
        comp_ref[:, 1:2, :] = comp_ref[:, 1:2, :] + part_sum


# ----------------------------------------------------------------------------
# Phase 2: 3x3 conv + BatchNorm(train stats) + sigmoid on the tiny maps
# ----------------------------------------------------------------------------
def _conv_bn_sigmoid_kernel(w_ref, p_ref, comp_ref, scale_ref, pad_ref, *, H, W):
    """w_ref:    SMEM (18,) f32  conv weight (1,2,3,3) flat [chan*9 + ky*3 + kx]
       p_ref:    SMEM (4,)  f32  (gamma, beta, eps, 1/C)
       comp_ref: VMEM (2, N, H, W) f32  (channel max, channel sum)
       scale_ref:VMEM (N, H, W) f32  output gate
       pad_ref:  VMEM scratch (2, N, H+2, W+2) f32  zero-padded maps.
       Everything here operates only on the tiny compress/conv maps."""
    N = comp_ref.shape[1]
    inv_c = p_ref[3]
    mx = comp_ref[0]                                   # (N, H, W)
    mn = comp_ref[1] * inv_c                           # channel mean

    # zero-padded maps for the SAME 3x3 conv
    pad_ref[...] = jnp.zeros(pad_ref.shape, pad_ref.dtype)
    pad_ref[0, :, 1:H + 1, 1:W + 1] = mx
    pad_ref[1, :, 1:H + 1, 1:W + 1] = mn

    # 3x3 conv, 2 in-channels -> 1 out-channel, no bias (taps unrolled on VPU;
    # contraction is only K=18 so the MXU would be <1% utilized).
    conv = jnp.zeros((N, H, W), jnp.float32)
    for ky in range(3):
        for kx in range(3):
            conv = (conv
                    + w_ref[0 * 9 + ky * 3 + kx] * pad_ref[0, :, ky:ky + H, kx:kx + W]
                    + w_ref[1 * 9 + ky * 3 + kx] * pad_ref[1, :, ky:ky + H, kx:kx + W])

    # BatchNorm2d(1), training-mode semantics: batch statistics, biased var.
    # TODO(synk): running_mean/running_var buffer updates (momentum=0.01) are
    # stateful bookkeeping and are not reproduced here.
    mu = jnp.mean(conv)
    var = jnp.mean((conv - mu) ** 2)
    gamma = p_ref[0]
    beta = p_ref[1]
    eps = p_ref[2]
    normed = (conv - mu) * lax.rsqrt(var + eps) * gamma + beta

    scale_ref[...] = 1.0 / (1.0 + jnp.exp(-normed))


# ----------------------------------------------------------------------------
# Phase 3: out = x * scale (broadcast over channels), fully parallel
# ----------------------------------------------------------------------------
def _apply_scale_kernel(x_ref, s_ref, o_ref):
    """x_ref: (1, TC, HW), s_ref: (1, 1, HW), o_ref: (1, TC, HW)."""
    o_ref[...] = x_ref[...] * s_ref[...]


# ----------------------------------------------------------------------------
# Wrapper
# ----------------------------------------------------------------------------
def _pick_channel_tile(C, HW, budget_bytes=4 << 20):
    """Largest channel tile that divides C and keeps a (TC, HW) f32 block under
    budget; prefers multiples of 8 (sublane-friendly) unless TC == C."""
    if C * HW * 4 <= budget_bytes:
        return C
    best = C
    for tc in range(8, C, 8):
        if C % tc == 0 and tc * HW * 4 <= budget_bytes:
            best = tc
    return best


def _vmem_limit(*buffer_bytes):
    """Scoped VMEM limit: double-buffered blocks + headroom, capped for v7x."""
    need = 2 * sum(buffer_bytes) + (4 << 20)
    return int(min(max(need, 8 << 20), 64 << 20))


def sa_layer(x, conv_w, gamma, beta, eps=1e-5):
    """x: (N,C,H,W) f32, conv_w: (1,2,3,3) f32."""
    N, C, H, W = x.shape
    HW = H * W
    x_flat = x.reshape(N, C, HW).astype(jnp.float32)   # lane-dense layout
    TC = _pick_channel_tile(C, HW)
    n_ct = C // TC

    # --- Phase 1: streamed channel max / sum -------------------------------
    comp = pl.pallas_call(
        _compress_kernel,
        out_shape=jax.ShapeDtypeStruct((N, 2, HW), jnp.float32),
        grid=(N, n_ct),
        in_specs=[pl.BlockSpec((1, TC, HW), lambda n, c: (n, c, 0))],
        out_specs=pl.BlockSpec((1, 2, HW), lambda n, c: (n, 0, 0)),
        compiler_params=pltpu.CompilerParams(
            dimension_semantics=("parallel", "arbitrary"),
            vmem_limit_bytes=_vmem_limit(TC * HW * 4, 2 * HW * 4)),
    )(x_flat)

    # --- Phase 2: conv + BN + sigmoid on the tiny compress maps ------------
    comp_sp = comp.reshape(N, 2, H, W).transpose(1, 0, 2, 3)      # (2, N, H, W)
    w_flat = conv_w.reshape(-1).astype(jnp.float32)               # (18,)
    params = jnp.array([gamma, beta, eps, 1.0 / C], dtype=jnp.float32)
    scale = pl.pallas_call(
        functools.partial(_conv_bn_sigmoid_kernel, H=H, W=W),
        out_shape=jax.ShapeDtypeStruct((N, H, W), jnp.float32),
        in_specs=[
            pl.BlockSpec(memory_space=pltpu.MemorySpace.SMEM),    # conv weights
            pl.BlockSpec(memory_space=pltpu.MemorySpace.SMEM),    # bn params
            pl.BlockSpec(memory_space=pltpu.MemorySpace.VMEM),    # compress maps
        ],
        out_specs=pl.BlockSpec(memory_space=pltpu.MemorySpace.VMEM),
        scratch_shapes=[pltpu.VMEM((2, N, H + 2, W + 2), jnp.float32)],
        compiler_params=pltpu.CompilerParams(
            vmem_limit_bytes=_vmem_limit(2 * N * HW * 4, N * HW * 4,
                                         2 * N * (H + 2) * (W + 2) * 4)),
    )(w_flat, params, comp_sp)

    # --- Phase 3: streamed, fully-parallel gate multiply --------------------
    scale_flat = scale.reshape(N, 1, HW)
    out_flat = pl.pallas_call(
        _apply_scale_kernel,
        out_shape=jax.ShapeDtypeStruct((N, C, HW), jnp.float32),
        grid=(N, n_ct),
        in_specs=[pl.BlockSpec((1, TC, HW), lambda n, c: (n, c, 0)),
                  pl.BlockSpec((1, 1, HW), lambda n, c: (n, 0, 0))],
        out_specs=pl.BlockSpec((1, TC, HW), lambda n, c: (n, c, 0)),
        compiler_params=pltpu.CompilerParams(
            dimension_semantics=("parallel", "parallel"),
            vmem_limit_bytes=_vmem_limit(TC * HW * 4, HW * 4, TC * HW * 4)),
    )(x_flat, scale_flat)

    return out_flat.reshape(N, C, H, W)


def sa_layer_ref(x, conv_w, gamma, beta, eps=1e-5):
    """Pure-JAX reference (mirrors the PyTorch module in train mode)."""
    mx = jnp.max(x, axis=1, keepdims=True)
    mn = jnp.mean(x, axis=1, keepdims=True)
    comp = jnp.concatenate([mx, mn], axis=1)
    conv = lax.conv_general_dilated(
        comp, conv_w, window_strides=(1, 1), padding="SAME",
        dimension_numbers=("NCHW", "OIHW", "NCHW"))
    mu = jnp.mean(conv)
    var = jnp.mean((conv - mu) ** 2)
    normed = (conv - mu) / jnp.sqrt(var + eps) * gamma + beta
    return x * jax.nn.sigmoid(normed)


if __name__ == "__main__":
    key = jax.random.PRNGKey(0)
    kx, kw = jax.random.split(key)

    N, C, H, W = 2, 4, 16, 16
    x = jax.random.normal(kx, (N, C, H, W), dtype=jnp.float32)

    # Deterministic parameter init (Conv2d(2,1,3) kaiming-uniform-like bound).
    fan_in = 2 * 3 * 3
    bound = 1.0 / (fan_in ** 0.5)
    conv_w = jax.random.uniform(kw, (1, 2, 3, 3), jnp.float32, -bound, bound)
    gamma, beta, eps = 1.0, 0.0, 1e-5   # BatchNorm2d(1) default affine init

    out = jax.block_until_ready(sa_layer(x, conv_w, gamma, beta, eps))
    ref = jax.block_until_ready(sa_layer_ref(x, conv_w, gamma, beta, eps))

    assert out.shape == (N, C, H, W)
    assert jnp.allclose(out, ref, atol=1e-5, rtol=1e-5), (
        f"max abs err {jnp.max(jnp.abs(out - ref))}")
    print("KERNEL_OK")
</pallas_src>

<mosaic_0001>
module attributes {stable_mosaic.version = 11 : i64} {
  func.func @_compress_kernel(%arg0: i32, %arg1: i32, %arg2: memref<1x4x256xf32, #tpu.memory_space<vmem>>, %arg3: memref<1x2x256xf32, #tpu.memory_space<vmem>>) attributes {dimension_semantics = [#tpu.dimension_semantics<parallel>, #tpu.dimension_semantics<arbitrary>], iteration_bounds = array<i64: 2, 1>, scalar_prefetch = 0 : i64, scratch_operands = 0 : i64, tpu.core_type = #tpu.core_type<tc>, window_params = [{transform_indices = @transform_0, window_bounds = array<i64: 1, 4, 256>}, {transform_indices = @transform_1, window_bounds = array<i64: 1, 2, 256>}]} {
    %c0 = arith.constant 0 : index
    %c0_0 = arith.constant 0 : index
    %c0_1 = arith.constant 0 : index
    %0 = vector.load %arg2[%c0, %c0_0, %c0_1] : memref<1x4x256xf32, #tpu.memory_space<vmem>>, vector<1x4x256xf32>
    %cst = arith.constant dense<0xFF800000> : vector<1x256xf32>
    %1 = vector.multi_reduction <maximumf>, %0, %cst [1] : vector<1x4x256xf32> to vector<1x256xf32>
    %2 = vector.shape_cast %1 : vector<1x256xf32> to vector<1x1x256xf32>
    %cst_2 = arith.constant dense<0.000000e+00> : vector<1x256xf32>
    %3 = vector.multi_reduction <add>, %0, %cst_2 [1] : vector<1x4x256xf32> to vector<1x256xf32>
    %4 = vector.shape_cast %3 : vector<1x256xf32> to vector<1x1x256xf32>
    %c0_i32 = arith.constant 0 : i32
    %5 = arith.cmpi eq, %arg1, %c0_i32 : i32
    %6 = arith.extui %5 : i1 to i32
    %c0_i32_3 = arith.constant 0 : i32
    %7 = arith.cmpi ne, %6, %c0_i32_3 : i32
    scf.if %7 {
      %c0_6 = arith.constant 0 : index
      %c0_7 = arith.constant 0 : index
      %c0_8 = arith.constant 0 : index
      %11 = vector.load %arg3[%c0_6, %c0_7, %c0_8] : memref<1x2x256xf32, #tpu.memory_space<vmem>>, vector<1x1x256xf32>
      tpu.vector_store %arg3[%c0_6, %c0_7, %c0_8], %2 {strides = array<i32>} : memref<1x2x256xf32, #tpu.memory_space<vmem>>, vector<1x1x256xf32>,
      %c0_9 = arith.constant 0 : index
      %c1 = arith.constant 1 : index
      %c0_10 = arith.constant 0 : index
      %12 = vector.load %arg3[%c0_9, %c1, %c0_10] : memref<1x2x256xf32, #tpu.memory_space<vmem>>, vector<1x1x256xf32>
      tpu.vector_store %arg3[%c0_9, %c1, %c0_10], %4 {strides = array<i32>} : memref<1x2x256xf32, #tpu.memory_space<vmem>>, vector<1x1x256xf32>,
    } else {
    }
    %c0_i32_4 = arith.constant 0 : i32
    %8 = arith.cmpi sgt, %arg1, %c0_i32_4 : i32
    %9 = arith.extui %8 : i1 to i32
    %c0_i32_5 = arith.constant 0 : i32
    %10 = arith.cmpi ne, %9, %c0_i32_5 : i32
    scf.if %10 {
      %c0_6 = arith.constant 0 : index
      %c0_7 = arith.constant 0 : index
      %c0_8 = arith.constant 0 : index
      %11 = vector.load %arg3[%c0_6, %c0_7, %c0_8] : memref<1x2x256xf32, #tpu.memory_space<vmem>>, vector<1x1x256xf32>
      %12 = arith.maximumf %11, %2 : vector<1x1x256xf32>
      %c0_9 = arith.constant 0 : index
      %c0_10 = arith.constant 0 : index
      %c0_11 = arith.constant 0 : index
      %13 = vector.load %arg3[%c0_9, %c0_10, %c0_11] : memref<1x2x256xf32, #tpu.memory_space<vmem>>, vector<1x1x256xf32>
      tpu.vector_store %arg3[%c0_9, %c0_10, %c0_11], %12 {strides = array<i32>} : memref<1x2x256xf32, #tpu.memory_space<vmem>>, vector<1x1x256xf32>,
      %c0_12 = arith.constant 0 : index
      %c1 = arith.constant 1 : index
      %c0_13 = arith.constant 0 : index
      %14 = vector.load %arg3[%c0_12, %c1, %c0_13] : memref<1x2x256xf32, #tpu.memory_space<vmem>>, vector<1x1x256xf32>
      %15 = arith.addf %14, %4 : vector<1x1x256xf32>
      %c0_14 = arith.constant 0 : index
      %c1_15 = arith.constant 1 : index
      %c0_16 = arith.constant 0 : index
      %16 = vector.load %arg3[%c0_14, %c1_15, %c0_16] : memref<1x2x256xf32, #tpu.memory_space<vmem>>, vector<1x1x256xf32>
      tpu.vector_store %arg3[%c0_14, %c1_15, %c0_16], %15 {strides = array<i32>} : memref<1x2x256xf32, #tpu.memory_space<vmem>>, vector<1x1x256xf32>,
    } else {
    }
    return
  }
  func.func @transform_0(%arg0: i32, %arg1: i32) -> (i32, i32, i32) {
    %c0_i32 = arith.constant 0 : i32
    %c0_i32_0 = arith.constant 0 : i32
    return %arg0, %arg1, %c0_i32 : i32, i32, i32
  }
  func.func @transform_1(%arg0: i32, %arg1: i32) -> (i32, i32, i32) {
    %c0_i32 = arith.constant 0 : i32
    %c0_i32_0 = arith.constant 0 : i32
    %c0_i32_1 = arith.constant 0 : i32
    return %arg0, %c0_i32, %c0_i32_0 : i32, i32, i32
  }
}

</mosaic_0001>

<bundles_post_ra>
// kernel: tpu_custom_call.1
= control target key start
LH: loop header
LB: loop body
LE: loop exit
PB: predicated region body
PF: predicated region fallthrough
CT: control target
= control target key end

     0   :  { %6 = vsyncpa [#allocation3], 0  ;;  %s760_s0 = inlined_call_operand.hbm [shape: f32[2,4,256], index: 0, kind: input, shape index: {}]   ;;  %s761_s1 = inlined_call_operand.hbm [shape: f32[2,2,256], index: 1, kind: output, shape index: {}]  }
   0x1   :  { %8 = vsyncpa [#allocation3 + $0x1], 0 }
   0x2   :  { %9 = vsyncpa [#allocation4], 0 }
   0x3   :  { %11 = vsyncpa [#allocation4 + $0x1], 0  ;;  %s587_s6 = smov 0   ;;  %s589_s7 = smov 0  }
   0x4   :  { %s591_s8 = smov 0   ;;  %s593_s9 = smov 0  }
   0x5   :  { %s595_s10 = smov 0   ;;  %s597_s11 = smov 0  }
   0x6 LB: > { %s376_s12 = sadd.s32 4294967295, %s572_s11   ;;  %s377_s13 = sadd.s32 4294967294, %s572_s11   ;;  %s572_s11 = sphi %s597_s11, %s17_s11   ;;  %s568_s10 = sphi %s595_s10, %s777_s10   ;;  %s564_s9 = sphi %s593_s9, %s776_s9   ;;  %s560_s8 = sphi %s591_s8, %s775_s8   ;;  %s556_s7 = sphi %s589_s7, %s774_s7   ;;  %s552_s6 = sphi %s587_s6, %s773_s6  }
   0x7   : > { %s29_s14 = sadd.s32 1, %s568_s10  ;;  %s38_s15 = sadd.s32 1, %s560_s8 }
   0x8   : > { %p31_p0 = scmp.ge.s32.totalorder %s29_s14, 2  ;;  %p45_p1 = scmp.ne.s32.totalorder %s560_s8, %s556_s7 }
   0x9   : > { %p46_p2 = scmp.eq.s32.totalorder %s572_s11, 0  ;;  %p51_p3 = scmp.ne.s32.totalorder %s556_s7, %s552_s6 }
   0xa   : > { %s779_s14 = smov (%p31_p0, %s29_s14), 0  ;;  %p52_p5 = scmp.eq.s32.totalorder %s376_s12, 0 }
   0xb   : > { %p628_p4 = por %p46_p2, %p45_p1  ;;  %s33_s17 = ssub.s32 %s568_s10, %s779_s14 }
   0xc   : > { %p75_p6 = scmp.eq.s32.totalorder %s376_s12, 1  ;;  %p36_p7 = scmp.eq.s32.totalorder %s33_s17, 0 }
   0xd   : > { %p634_p8 = por %p52_p5, %p51_p3  ;;  %p81_p10 = scmp.eq.s32.totalorder %s377_s13, 1 }
   0xe   : > { %p638_p9 = por %p75_p6, %p45_p1  ;;  %p408_p13 = scmp.lt.s32.totalorder %s572_s11, 2 }
   0xf   : > { %s643_s20 = scalar_select %p36_p7, %s560_s8, %s38_s15  }
  0x10   : > { %s765_s19 = scalar_select %p638_p9, 1, 0 }
  0x11   : > { %p645_p11 = por %p81_p10, %p51_p3  ;;  %s101_s22 = sand.u32 1, %s560_s8  }
  0x12   : > { %s380_s23 = sshll.u32 %s101_s22, 3  ;;  %s394_s24 = sshll.u32 %s568_s10, 7 }
  0x13   : > { %s766_s21 = scalar_select %p645_p11, 1, 0 }
  0x14   : > { %s656_s27 = scalar_lea.hbm %s760_s0, %s394_s24  ;;  %s105_s28 = scalar_lea.vmem [#allocation2], %s380_s23 }
  0x15   : > { %s115_s29 = sshll.u32 %s105_s28, 4  ;;  %p662_p0 = pnand %p408_p13, %p628_p4  ;;  %s658_s29 = int_to_ptr.vmem [resolvable:$true] %s115_s29 }
  0x16   : > { %s102_s2 = scalar_lea.sflag [#allocation3], %s101_s22  ;;  %s460_s3 = scalar_lea.hbm %s656_s27, 128 }
  0x17   : > { %p461_p3 = scmp.ne.s32.totalorder %s656_s27, %s460_s3  ;;  %p462_p5 = pneg %p662_p0 }
  0x18   : > { %s465_s12 = scalar_lea.hbm %s760_s0, 256  ;;  %p466_p4 = scmp.lt.u32.totalorder %s656_s27, %s760_s0 }
  0x19   : > { %p463_p6 = pnand %p462_p5, %p461_p3  ;;  %p467_p10 = scmp.lt.u32.totalorder %s465_s12, %s460_s3 }
  0x1a   : > { %p469_p12 = scmp.lt.u32.totalorder %s460_s3, %s656_s27 }
  0x1b   : > { %p464_p7 = pneg %p463_p6  ;;  %p468_p13 = por %p467_p10, %p466_p4 }
  0x1d   : > { %p470_p1 = por %p469_p12, %p468_p13 }
  0x1f   : > { %p471_p2 = pnand %p470_p1, %p464_p7 }
  0x21   : > { %474 = shalt.err (!%p471_p2)
}
  0x22   : > { %s475_s16 = scalar_lea.vmem %s658_s29, 128  ;;  %s574_s17 = smov [#allocation2]  }
  0x23   : > { %p476_p3 = scmp.ne.s32.totalorder %s658_s29, %s475_s16  ;;  %s480_s22 = sshll.u32 %s574_s17, 4  ;;  %s481_s22 = int_to_ptr.vmem [resolvable:$false] %s480_s22 }
  0x24   : > { %s482_s23 = scalar_lea.vmem %s481_s22, 256  ;;  %p483_p9 = scmp.lt.s32.totalorder %s658_s29, %s481_s22 }
  0x25   : > { %p478_p6 = pnand %p476_p3, %p462_p5  ;;  %p484_p4 = scmp.lt.s32.totalorder %s482_s23, %s475_s16 }
  0x27   : > { %p479_p11 = pneg %p478_p6  ;;  %p485_p10 = por %p484_p4, %p483_p9 }
  0x29   : > { %p486_p12 = pnand %p485_p10, %p479_p11 }
  0x2b   : > { %489 = shalt.err (!%p486_p12)
}
  0x2c   : > { %403 = dma.hbm_to_vmem [thread:$0]  (!%p662_p0), %s656_s27, 128, %s658_s29, %s102_s2  }
  0x2d   : > { %p768_p1 = scmp.lt.s32.totalorder %s572_s11, 3  ;;  %p769_p2 = scmp.ge.s32.totalorder %s572_s11, 1 }
  0x2f   : > { %p121_p5 = pnand %p769_p2, %p768_p1 }
  0x30   : > { %s698_s24 = sand.u32 (!%p121_p5), 1, %s556_s7  }
  0x31   : > { %124 = sbr.rel (%p121_p5) target bundleno = 93 (0x5d), region = 24  ;;  %s384_s25 = sshll.u32 (!%p121_p5), %s698_s24, 3 }
  0x32   : > { %s127_s26 = scalar_lea.sflag (!%p121_p5), [#allocation3], %s698_s24  ;;  %s130_s28 = scalar_lea.vmem (!%p121_p5), [#allocation2], %s384_s25 }
  0x38   : > { %543 = dma.done.wait (%p634_p8), %s127_s26, 128  }
  0x39   : > { %545 = vsyncadd (%p634_p8), %s127_s26, 4294967168  ;;  %vm153_vm0 = vcmask 1043456   ;;  %v149_v0 = vld [vmem:[%s130_s28] sm:$0xff]  ;;  %v575_v12 = vmov 1966171168   ;;  %v192_v14 = vlaneseq  ;;  %s385_s18 = sshll.u32 %s698_s24, 2 }
  0x3a   : > { %v151_v1 = vcombine.high %v149_v0, %v149_v0  ;;  %v154_v2 = vsel %vm153_vm0, %v149_v0, -inf  ;;  %v168_v3 = vsel %vm153_vm0, %v149_v0, 0.0  ;;  %v190_v13 = vunpack.c.l.s4 %v575_v12  ;;  %s148_s27 = scalar_lea.vmem [#allocation5], %s385_s18  ;;  %s395_s30 = sshll.u32 %s564_s9, 6 }
  0x3b   : > { %v155_v4 = vrot.slane %v154_v2, 4  ;;  %v169_v5 = vrot.slane %v168_v3, 4  ;;  %v193_v24 = vshrl.u32 %v192_v14, 7  ;;  %s295_s29 = sshll.u32 %s148_s27, 4  ;;  %vm206_vm1 = vcmp.lt.s32.totalorder %v192_v14, 256  ;;  %s713_s4 = scalar_lea.hbm %s761_s1, %s395_s30  ;;  %s708_s29 = int_to_ptr.vmem [resolvable:$true] %s295_s29 }
  0x3c   : > { %v161_v6 = vsel %vm153_vm0, %v151_v1, -inf  ;;  %v175_v7 = vsel %vm153_vm0, %v151_v1, 0.0  ;;  %v191_v23 = vunpack.c.0.s8 %v190_v13  ;;  %s281_s5 = scalar_lea.sflag [#allocation4], %s698_s24  ;;  %s490_s12 = scalar_lea.vmem %s708_s29, 64 }
  0x3d   : > { %v156_v8 = vmax.f32 %v154_v2, %v155_v4  ;;  %v162_v9 = vrot.slane %v161_v6, 4  ;;  %v170_v10 = vadd.f32 %v169_v5, %v168_v3  ;;  %v176_v11 = vrot.slane %v175_v7, 4  ;;  %p491_p8 = scmp.ne.s32.totalorder %s708_s29, %s490_s12  ;;  %p770_p9 = scmp.ne.s32.totalorder %s765_s19, 0 }
  0x3e   : > { %v194_v34 = vsub.s32 %v191_v23, %v193_v24  ;;  %s576_s9 = smov [#allocation5]  }
  0x3f   : > { %v157_v15 = vrot.slane %v156_v8, 2  ;;  %v163_v16 = vmax.f32 %v161_v6, %v162_v9  ;;  %v171_v17 = vrot.slane %v170_v10, 2  ;;  %v177_v18 = vadd.f32 %v176_v11, %v175_v7  ;;  %p492_p11 = pnand %p491_p8, %p770_p9  ;;  %s494_s13 = sshll.u32 %s576_s9, 4  ;;  %s495_s13 = int_to_ptr.vmem [resolvable:$false] %s494_s13 }
  0x40   : > { %s496_s15 = scalar_lea.vmem %s495_s13, 128  ;;  %p497_p7 = scmp.lt.s32.totalorder %s708_s29, %s495_s13 }
  0x41   : > { %v158_v19 = vmax.f32 %v156_v8, %v157_v15  ;;  %v164_v20 = vrot.slane %v163_v16, 2  ;;  %v172_v21 = vadd.f32 %v171_v17, %v170_v10  ;;  %v178_v22 = vrot.slane %v177_v18, 2  ;;  %p493_p0 = pneg %p492_p11  ;;  %p498_p13 = scmp.lt.s32.totalorder %s496_s15, %s490_s12 }
  0x43   : > { %v159_v25 = vrot.slane %v158_v19, 1  ;;  %v165_v26 = vmax.f32 %v163_v16, %v164_v20  ;;  %v173_v27 = vrot.slane %v172_v21, 1  ;;  %v179_v28 = vadd.f32 %v178_v22, %v177_v18  ;;  %p499_p3 = por %p498_p13, %p497_p7 }
  0x45   : > { %v160_v29 = vmax.f32 %v158_v19, %v159_v25  ;;  %v166_v30 = vrot.slane %v165_v26, 1  ;;  %v174_v31 = vadd.f32 %v173_v27, %v172_v21  ;;  %v180_v32 = vrot.slane %v179_v28, 1  ;;  %p500_p6 = pnand %p499_p3, %p493_p0 }
  0x47   : > { %v167_v33 = vmax.f32 %v165_v26, %v166_v30  ;;  %v181_v35 = vadd.f32 %v180_v32, %v179_v28 }
  0x49   : > { %v188_v36 = vcombine.low %v160_v29, %v167_v33  ;;  %v211_v37 = vcombine.low %v174_v31, %v181_v35 }
  0x4b   : > { %v195_v38 = vrot.slane %v188_v36, %v194_v34  ;;  %v218_v39 = vrot.slane %v211_v37, %v194_v34 }
  0x4d   : > { %v202_v40 = vrot.slane %v195_v38, %v194_v34  ;;  %v225_v41 = vrot.slane %v218_v39, %v194_v34 }
  0x4f   : > { %208 = vst.msk [vmem:[%s148_s27] ss:$2 sm:$0x3] %vm206_vm1, %v202_v40  ;;  %386 = vst.msk [vmem:[%s148_s27 + $0x1] ss:$2 sm:$0x3] %vm206_vm1, %v225_v41 }
  0x50   : > { %503 = shalt.err (!%p500_p6)
}
  0x51   : > { %s504_s16 = scalar_lea.hbm %s713_s4, 64  ;;  %s508_s23 = scalar_lea.hbm %s761_s1, 128 }
  0x52   : > { %p505_p4 = scmp.ne.s32.totalorder %s713_s4, %s504_s16  ;;  %p509_p1 = scmp.lt.u32.totalorder %s713_s4, %s761_s1 }
  0x53   : > { %p510_p2 = scmp.lt.u32.totalorder %s508_s23, %s504_s16  ;;  %p512_p8 = scmp.lt.u32.totalorder %s504_s16, %s713_s4 }
  0x54   : > { %p506_p10 = pnand %p505_p4, %p770_p9 }
  0x55   : > { %p511_p5 = por %p510_p2, %p509_p1 }
  0x56   : > { %p507_p12 = pneg %p506_p10 }
  0x57   : > { %p513_p11 = por %p512_p8, %p511_p5 }
  0x59   : > { %p514_p0 = pnand %p513_p11, %p507_p12 }
  0x5b   : > { %517 = shalt.err (!%p514_p0)
}
  0x5c   : > { %398 = dma.vmem_to_hbm [thread:$0]  (%p770_p9), %s708_s29, 64, %s713_s4, %s281_s5  }
  0x5d PF: > { %s307_s26 = sand.u32 1, %s552_s6   ;;  %p771_p7 = scmp.ne.s32.totalorder %s766_s21, 0 }
  0x5e   : > { %p772_p13 = scmp.ge.s32.totalorder %s572_s11, 2  ;;  %s308_s28 = scalar_lea.sflag [#allocation4], %s307_s26 }
  0x60   : > { %p405_p3 = pnand %p772_p13, %p771_p7 }
  0x62   : > { %547 = dma.done.wait (!%p405_p3), %s308_s28, 64  }
  0x63   : > { %549 = vsyncadd (!%p405_p3), %s308_s28, 4294967232  ;;  %s17_s11 = sadd.s32 1, %s572_s11   ;;  %s773_s6 = smov %s556_s7 }
  0x64   : > { %p14_p6 = scmp.ge.s32.totalorder %s17_s11, 4   ;;  %s774_s7 = smov %s560_s8 }
  0x65   : > { %s775_s8 = smov %s643_s20  ;;  %s776_s9 = smov %s568_s10 }
  0x66   : > { %s777_s10 = smov %s779_s14  ;;  %16 = sbr.rel (!%p14_p6) target bundleno = 6 (0x6), region = 79 }
  0x6d   :  { %313 = vsyncpa [#allocation3], 1 }
  0x6e   :  { %315 = vsyncpa [#allocation3 + $0x1], 1 }
  0x6f   :  { %316 = vsyncpa [#allocation4], 1 }
  0x70   :  { %318 = vsyncpa [#allocation4 + $0x1], 1 }

</bundles_post_ra>
